<compile_context>
chip_gen: v6e
topology: v6e:2x2x1
jax: 0.10.0
libtpu: 0.0.40
codegen_flags: <defaults>
</compile_context>

<pallas_src>
import jax
import jax.numpy as jnp
from jax import lax
from jax.experimental import pallas as pl
from jax.experimental.pallas import tpu as pltpu

_LANES = 128
_SUBLANES = 8
_ONEHOT_MAX_ROWS = 4096     # use the MXU one-hot gather up to this table height
_MAX_IDX_CHUNK = 1 << 16    # cap per-call batch (SMEM idx prefetch / grid size)


def _round_up(x, m):
    return ((x + m - 1) // m) * m


def _vmem_capacity_bytes():
    try:
        return int(pltpu.get_tpu_info().vmem_capacity_bytes)
    except Exception:
        pass
    try:
        kind = jax.devices()[0].device_kind.lower()
    except Exception:
        kind = ""
    # v7x has 64 MiB per TensorCore; v5e / v6e have 128 MiB per core.
    if "v7" in kind or "7x" in kind:
        return 64 * 1024 * 1024
    return 128 * 1024 * 1024


def _probe_pipeline_mode():
    try:
        pl.BlockSpec((_SUBLANES, _LANES), lambda i: (0, 0),
                     pipeline_mode=pl.Buffered(1))
        return True
    except (TypeError, AttributeError):
        return False


_HAS_PIPELINE_MODE = _probe_pipeline_mode()


def _table_spec(n_sample, n_rep_p, index_map):
    """Whole-table BlockSpec.  Constant index_map -> the block never changes,
    so single-buffer it (pl.Buffered(1)) to occupy 1x (not 2x) VMEM."""
    if _HAS_PIPELINE_MODE:
        return pl.BlockSpec((n_sample, n_rep_p), index_map,
                            pipeline_mode=pl.Buffered(1))
    return pl.BlockSpec((n_sample, n_rep_p), index_map)


def _resident_dim_semantics(b_p, n_sample):
    # "parallel" makes each TensorCore (v7x megacore) DMA its own copy of the
    # resident table; only worth it when output volume dominates the table read.
    return ("parallel",) if b_p >= n_sample else ("arbitrary",)


def _pick_tile_rows(requested, batch, per_row_bytes, vmem_left):
    tb = min(int(requested), _round_up(batch, _SUBLANES))
    tb = max(_SUBLANES, _round_up(tb, _SUBLANES))
    while tb > _SUBLANES and tb * per_row_bytes > max(int(vmem_left), 1):
        tb = max(_SUBLANES, _round_up(tb // 2, _SUBLANES))
    return tb


# ------------------------------ kernels -------------------------------------

def _onehot_gather_kernel(z_ref, idx_ref, out_ref):
    # z_ref:   VMEM (n_sample, n_rep_p)  resident table
    # idx_ref: VMEM (tb, 1) int32        row ids for this output tile
    # out_ref: VMEM (tb, n_rep_p)
    tb = out_ref.shape[0]
    n_sample = z_ref.shape[0]
    ids = idx_ref[...]                                             # (tb, 1)
    cols = lax.broadcasted_iota(jnp.int32, (tb, n_sample), 1)      # (tb, n_sample)
    one_hot = (cols == ids).astype(z_ref.dtype)
    out_ref[...] = jnp.dot(one_hot, z_ref[...],
                           preferred_element_type=jnp.float32).astype(out_ref.dtype)


def _loop_gather_kernel(idx_ref, z_ref, out_ref):
    # idx_ref: SMEM int32[b_p] (scalar prefetch)
    # z_ref:   VMEM (n_sample, n_rep_p)  resident table
    # out_ref: VMEM (tb, n_rep_p)
    tb = out_ref.shape[0]
    base = pl.program_id(0) * tb

    def body(r, carry):
        row = idx_ref[base + r]
        out_ref[pl.ds(r, 1), :] = z_ref[pl.ds(row, 1), :]
        return carry

    lax.fori_loop(0, tb, body, 0, unroll=8)


def _dma_gather_kernel(idx_ref, z_hbm, out_ref, row_buf, sem):
    # idx_ref: SMEM int32[b_p] (scalar prefetch)
    # z_hbm:   HBM ref (n_sample, n_rep_p)  (memory_space=pl.ANY)
    # out_ref: VMEM (tb, n_rep_p)
    # row_buf: VMEM (tb, n_rep_p) scratch
    # sem:     DMA semaphore array (1,), shared by all row copies of the tile
    tb = out_ref.shape[0]
    base = pl.program_id(0) * tb

    def start(r, carry):
        row = idx_ref[base + r]
        pltpu.make_async_copy(z_hbm.at[pl.ds(row, 1), :],
                              row_buf.at[pl.ds(r, 1), :],
                              sem.at[0]).start()
        return carry

    lax.fori_loop(0, tb, start, 0, unroll=8)

    def wait(r, carry):
        # Descriptor shape only determines the expected byte count; all row
        # copies share `sem`, so tb waits of one row each drain it exactly.
        pltpu.make_async_copy(z_hbm.at[pl.ds(0, 1), :],
                              row_buf.at[pl.ds(r, 1), :],
                              sem.at[0]).wait()
        return carry

    lax.fori_loop(0, tb, wait, 0, unroll=8)
    out_ref[...] = row_buf[...]


# ---------------------------- pallas_call wrappers ---------------------------

def _onehot_forward(z_p, idx_p, tb, dim_sem, vmem_limit):
    n_sample, n_rep_p = z_p.shape
    b_p = idx_p.shape[0]
    n_tiles = b_p // tb
    idx_col = idx_p.reshape(b_p, 1)
    itemsize = jnp.dtype(z_p.dtype).itemsize

    grid_spec = pltpu.PrefetchScalarGridSpec(
        num_scalar_prefetch=0,
        grid=(n_tiles,),
        in_specs=[_table_spec(n_sample, n_rep_p, lambda i: (0, 0)),
                  pl.BlockSpec((tb, 1), lambda i: (i, 0))],
        out_specs=pl.BlockSpec((tb, n_rep_p), lambda i: (i, 0)),
    )
    cost = pl.CostEstimate(
        flops=int(2 * b_p * n_sample * n_rep_p),
        transcendentals=0,
        bytes_accessed=int((n_sample * n_rep_p + 2 * b_p * n_rep_p) * itemsize),
    )
    return pl.pallas_call(
        _onehot_gather_kernel,
        out_shape=jax.ShapeDtypeStruct((b_p, n_rep_p), z_p.dtype),
        grid_spec=grid_spec,
        compiler_params=pltpu.CompilerParams(
            dimension_semantics=dim_sem, vmem_limit_bytes=int(vmem_limit)),
        cost_estimate=cost,
    )(z_p, idx_col)


def _loop_forward(z_p, idx_p, tb, dim_sem, vmem_limit):
    n_sample, n_rep_p = z_p.shape
    b_p = idx_p.shape[0]
    n_tiles = b_p // tb
    itemsize = jnp.dtype(z_p.dtype).itemsize

    grid_spec = pltpu.PrefetchScalarGridSpec(
        num_scalar_prefetch=1,
        grid=(n_tiles,),
        in_specs=[_table_spec(n_sample, n_rep_p, lambda i, idx_ref: (0, 0))],
        out_specs=pl.BlockSpec((tb, n_rep_p), lambda i, idx_ref: (i, 0)),
    )
    cost = pl.CostEstimate(
        flops=0,
        transcendentals=0,
        bytes_accessed=int((n_sample * n_rep_p + 2 * b_p * n_rep_p) * itemsize),
    )
    return pl.pallas_call(
        _loop_gather_kernel,
        out_shape=jax.ShapeDtypeStruct((b_p, n_rep_p), z_p.dtype),
        grid_spec=grid_spec,
        compiler_params=pltpu.CompilerParams(
            dimension_semantics=dim_sem, vmem_limit_bytes=int(vmem_limit)),
        cost_estimate=cost,
    )(idx_p, z_p)


def _dma_forward(z_p, idx_p, tb, vmem_limit):
    n_sample, n_rep_p = z_p.shape
    b_p = idx_p.shape[0]
    n_tiles = b_p // tb
    itemsize = jnp.dtype(z_p.dtype).itemsize

    grid_spec = pltpu.PrefetchScalarGridSpec(
        num_scalar_prefetch=1,
        grid=(n_tiles,),
        in_specs=[pl.BlockSpec(memory_space=pl.ANY)],     # z stays in HBM
        out_specs=pl.BlockSpec((tb, n_rep_p), lambda i, idx_ref: (i, 0)),
        scratch_shapes=[pltpu.VMEM((tb, n_rep_p), z_p.dtype),
                        pltpu.SemaphoreType.DMA((1,))],
    )
    cost = pl.CostEstimate(
        flops=0,
        transcendentals=0,
        bytes_accessed=int(2 * b_p * n_rep_p * itemsize + 4 * b_p),
    )
    return pl.pallas_call(
        _dma_gather_kernel,
        out_shape=jax.ShapeDtypeStruct((b_p, n_rep_p), z_p.dtype),
        grid_spec=grid_spec,
        compiler_params=pltpu.CompilerParams(
            dimension_semantics=("parallel",), vmem_limit_bytes=int(vmem_limit)),
        cost_estimate=cost,
    )(idx_p, z_p)


# --------------------------------- wrapper -----------------------------------

def representation_layer_forward(z, idx=None, *, tile_rows=512, gather_mode="auto"):
    """Pallas implementation of RepresentationLayer.forward.

    z:   (n_sample, n_rep) representation table.
    idx: optional 1-D integer index vector of length B.
    Returns z if idx is None, else z[idx] with shape (B, n_rep).
    gather_mode: "auto" | "onehot" | "loop" | "dma"  (mostly for testing).
    """
    if idx is None:
        # forward() with no index returns the full parameter tensor.
        return z

    n_sample, n_rep = z.shape
    idx = jnp.asarray(idx, dtype=jnp.int32)
    if idx.ndim != 1:
        raise ValueError("idx must be a 1-D index vector")
    (b,) = idx.shape

    # Chunk huge batches so the scalar-prefetched index vector stays well
    # inside SMEM (int32[b] pads to next_pow2(4b) bytes) and grids stay modest.
    if b > _MAX_IDX_CHUNK:
        parts = [representation_layer_forward(
                    z, idx[s:s + _MAX_IDX_CHUNK],
                    tile_rows=tile_rows, gather_mode=gather_mode)
                 for s in range(0, b, _MAX_IDX_CHUNK)]
        return jnp.concatenate(parts, axis=0)

    # TODO(synk): PyTorch raises on out-of-range indices; TPU DMA has no
    #             runtime bounds check, so clamp instead.
    idx = jnp.clip(idx, 0, n_sample - 1)

    itemsize = jnp.dtype(z.dtype).itemsize
    n_rep_p = _round_up(n_rep, _LANES)                 # lane-dense output rows
    z_p = z if n_rep_p == n_rep else jnp.pad(z, ((0, 0), (0, n_rep_p - n_rep)))

    vmem_budget = int(_vmem_capacity_bytes() * 0.85)
    table_bufs = 1 if _HAS_PIPELINE_MODE else 2        # table is single-buffered
    table_bytes = table_bufs * n_sample * n_rep_p * itemsize
    margin = 2 << 20

    if gather_mode == "auto":
        min_tile_bytes = 2 * _SUBLANES * n_rep_p * itemsize
        if table_bytes + min_tile_bytes + margin <= vmem_budget:
            gather_mode = "onehot" if n_sample <= _ONEHOT_MAX_ROWS else "loop"
        else:
            gather_mode = "dma"

    if gather_mode == "onehot":
        per_row = 2 * n_rep_p * itemsize + 4 * n_sample + 4 * n_rep_p
        tb = _pick_tile_rows(tile_rows, b, per_row,
                             vmem_budget - table_bytes - margin)
    elif gather_mode == "loop":
        per_row = 2 * n_rep_p * itemsize
        tb = _pick_tile_rows(tile_rows, b, per_row,
                             vmem_budget - table_bytes - margin)
    elif gather_mode == "dma":
        per_row = 3 * n_rep_p * itemsize
        tb = _pick_tile_rows(min(tile_rows, 256), b, per_row,
                             vmem_budget - margin)
    else:
        raise ValueError(f"unknown gather_mode: {gather_mode!r}")

    b_p = _round_up(b, tb)
    idx_p = idx if b_p == b else jnp.pad(idx, (0, b_p - b))

    if gather_mode == "onehot":
        out = _onehot_forward(z_p, idx_p, tb,
                              _resident_dim_semantics(b_p, n_sample), vmem_budget)
    elif gather_mode == "loop":
        out = _loop_forward(z_p, idx_p, tb,
                            _resident_dim_semantics(b_p, n_sample), vmem_budget)
    else:
        out = _dma_forward(z_p, idx_p, tb, vmem_budget)

    if b_p != b or n_rep_p != n_rep:
        # NOTE: the un-padding slice costs one extra read+write of the output;
        # callers that can consume the padded (b_p, n_rep_p) layout should.
        out = out[:b, :n_rep]
    return out


if __name__ == "__main__":
    key = jax.random.PRNGKey(0)
    k_z, k_idx = jax.random.split(key)

    # Small shapes that exercise both paddings:
    # n_rep=96 (not a multiple of 128), batch=37 (not a multiple of the tile).
    n_sample, n_rep, batch = 64, 96, 37

    # Deterministic "custom" value_init (the 'zero' branch would make the
    # output trivially all-zeros, so the custom-tensor branch is exercised).
    z = jax.random.normal(k_z, (n_sample, n_rep), dtype=jnp.float32)
    idx = jax.random.randint(k_idx, (batch,), 0, n_sample, dtype=jnp.int32)
    ref = z[idx]

    # Default path: table-resident MXU one-hot gather.
    out = jax.block_until_ready(representation_layer_forward(z, idx))
    assert out.shape == (batch, n_rep)
    assert jnp.allclose(out, ref, atol=1e-3, rtol=1e-3), \
        "one-hot resident gather mismatch vs z[idx]"

    # Resident copy-loop path, forced with a small tile so the grid has >1 step.
    out_loop = jax.block_until_ready(
        representation_layer_forward(z, idx, tile_rows=16, gather_mode="loop"))
    assert out_loop.shape == (batch, n_rep)
    assert jnp.array_equal(out_loop, ref), "loop-path gather mismatch vs z[idx]"

    # Large-table manual-DMA path, forced so it is exercised on-device.
    out_dma = jax.block_until_ready(
        representation_layer_forward(z, idx, tile_rows=16, gather_mode="dma"))
    assert out_dma.shape == (batch, n_rep)
    assert jnp.array_equal(out_dma, ref), "dma-path gather mismatch vs z[idx]"

    # forward(None): returns the full table.
    full = jax.block_until_ready(representation_layer_forward(z, None))
    assert jnp.array_equal(full, z), "no-index forward mismatch vs z"

    print("KERNEL_OK")
</pallas_src>

<mosaic_0001>
module attributes {stable_mosaic.version = 11 : i64} {
  func.func @_onehot_gather_kernel(%arg0: i32, %arg1: memref<64x128xf32, #tpu.memory_space<vmem>>, %arg2: memref<40x1xi32, #tpu.memory_space<vmem>>, %arg3: memref<40x128xf32, #tpu.memory_space<vmem>>) attributes {dimension_semantics = [#tpu.dimension_semantics<arbitrary>], iteration_bounds = array<i64: 1>, scalar_prefetch = 0 : i64, scratch_operands = 0 : i64, tpu.core_type = #tpu.core_type<tc>, window_params = [{pipeline_mode = #tpu.pipeline_mode<synchronous>, transform_indices = @transform_0, window_bounds = array<i64: 64, 128>}, {transform_indices = @transform_1, window_bounds = array<i64: 40, 1>}, {transform_indices = @transform_2, window_bounds = array<i64: 40, 128>}]} {
    %c0 = arith.constant 0 : index
    %c0_0 = arith.constant 0 : index
    %0 = vector.load %arg2[%c0, %c0_0] : memref<40x1xi32, #tpu.memory_space<vmem>>, vector<40x1xi32>
    %1 = tpu.iota {dimensions = array<i32: 1>} : vector<40x64xi32>
    %2 = vector.broadcast %0 : vector<40x1xi32> to vector<40x64xi32>
    %3 = arith.cmpi eq, %1, %2 : vector<40x64xi32>
    %4 = arith.extui %3 : vector<40x64xi1> to vector<40x64xi32>
    %5 = arith.sitofp %4 : vector<40x64xi32> to vector<40x64xf32>
    %c0_1 = arith.constant 0 : index
    %c0_2 = arith.constant 0 : index
    %6 = vector.load %arg1[%c0_1, %c0_2] : memref<64x128xf32, #tpu.memory_space<vmem>>, vector<64x128xf32>
    %cst = arith.constant dense<0.000000e+00> : vector<40x128xf32>
    %7 = tpu.matmul %5, %6, %cst {dimension_numbers = #tpu.dot_dimension_numbers<[1], [0], [0], [1], [0, 0, 1, 1], [], []>} : vector<40x64xf32>, vector<64x128xf32>, vector<40x128xf32> -> vector<40x128xf32>
    %c0_3 = arith.constant 0 : index
    %c0_4 = arith.constant 0 : index
    %8 = vector.load %arg3[%c0_3, %c0_4] : memref<40x128xf32, #tpu.memory_space<vmem>>, vector<40x128xf32>
    tpu.vector_store %arg3[%c0_3, %c0_4], %7 {strides = array<i32>} : memref<40x128xf32, #tpu.memory_space<vmem>>, vector<40x128xf32>,
    return
  }
  func.func @transform_0(%arg0: i32) -> (i32, i32) {
    %c0_i32 = arith.constant 0 : i32
    %c0_i32_0 = arith.constant 0 : i32
    %c0_i32_1 = arith.constant 0 : i32
    return %c0_i32, %c0_i32_0 : i32, i32
  }
  func.func @transform_1(%arg0: i32) -> (i32, i32) {
    %c0_i32 = arith.constant 0 : i32
    %c0_i32_0 = arith.constant 0 : i32
    return %arg0, %c0_i32 : i32, i32
  }
  func.func @transform_2(%arg0: i32) -> (i32, i32) {
    %c0_i32 = arith.constant 0 : i32
    %c0_i32_0 = arith.constant 0 : i32
    return %arg0, %c0_i32 : i32, i32
  }
}

</mosaic_0001>

<bundles_post_ra>
// kernel: tpu_custom_call.1
= control target key start
LH: loop header
LB: loop body
LE: loop exit
PB: predicated region body
PF: predicated region fallthrough
CT: control target
= control target key end

     0   :  { %7 = vsyncpa [#allocation3], 0  ;;  %s407_s0 = inlined_call_operand.hbm [shape: f32[64,128], index: 0, kind: input, shape index: {}]   ;;  %s408_s1 = inlined_call_operand.vmem [shape: s32[40,1], index: 1, kind: input, shape index: {}]   ;;  %s409_s2 = inlined_call_operand.hbm [shape: f32[40,128], index: 2, kind: output, shape index: {}]  }
   0x1   :  { %8 = vsyncpa [#allocation4], 0  ;;  %s322_s9 = smov [#allocation2]  }
   0x2   :  { %s14_s10 = sshll.u32 %s322_s9, 4  ;;  %s15_s10 = int_to_ptr.vmem [resolvable:$true] %s14_s10 }
   0x3   :  { %s286_s11 = scalar_lea.vmem %s15_s10, 1024  ;;  %p291_p1 = scmp.lt.s32.totalorder %s15_s10, %s15_s10 }
   0x4   :  { %p287_p0 = scmp.ne.s32.totalorder %s15_s10, %s286_s11  ;;  %p292_p2 = scmp.lt.s32.totalorder %s286_s11, %s286_s11 }
   0x6   :  { %p293_p3 = por %p292_p2, %p291_p1 }
   0x8   :  { %p294_p4 = pnand %p293_p3, %p287_p0 }
   0xa   :  { %297 = shalt.err (!%p294_p4)
}
   0xb   :  { %s323_s12 = smov 128   ;;  %s324_s13 = smov 8  }
   0xc   :  { %20 = dma.hbm_to_vmem [thread:$0]  %s407_s0, 1024, %s15_s10, [#allocation3], %s323_s12, %s323_s12, %s324_s13  }
   0xd   :  { %318 = dma.done.wait [#allocation3], 1024  }
   0xe   :  { %319 = vsyncadd [#allocation3], 4294966272  ;;  %v325_v0 = vmov 0   ;;  %v326_v1 = vmov 0.0   ;;  %vm327_vm0 = vmmov 0   ;;  %v29_v2 = vld [vmem:[%s408_s1 + $0x18] sm:$0xff]  ;;  %v31_v15 = vlaneseq }
   0xf   :  { %277 = vset.pattern.permute.xlu1 %v325_v0  ;;  %276 = vset.pattern.permute.xlu0 %v325_v0  ;;  %v26_v3 = vld [vmem:[%s408_s1] sm:$0xff]  ;;  %v70_v4 = vld [vmem:[#allocation2 + $0x38] sm:$0xff]  ;;  %v28_v5 = vld [vmem:[%s408_s1 + $0x10] sm:$0xff]  ;;  %vm71_vm1 = vcmask 523264  }
  0x10   :  { %222 = vmatprep.subr.mxu0 %v326_v1  ;;  %253 = vmatprep.subr.mxu1 %v326_v1  ;;  %v27_v6 = vld [vmem:[%s408_s1 + $0x8] sm:$0xff]  ;;  %v69_v7 = vld [vmem:[#allocation2 + $0x30] sm:$0xff]  ;;  %v30_v9 = vld [vmem:[%s408_s1 + $0x20] sm:$0xff]  ;;  %v32_v16 = vand.u32 127, %v31_v15  ;;  %s328_s1 = smov [#allocation5]  }
  0x11   :  { %238 = vmatprep.mubr.msk.f32.mxu0 %vm327_vm0, %v326_v1  ;;  %247 = vmatprep.mubr.msk.f32.mxu1 %vm327_vm0, %v326_v1  ;;  %v68_v8 = vld [vmem:[#allocation2 + $0x28] sm:$0xff]  ;;  %v67_v10 = vld [vmem:[#allocation2 + $0x20] sm:$0xff]  ;;  %v66_v11 = vld [vmem:[#allocation2 + $0x18] sm:$0xff]  ;;  %s187_s25 = sshll.u32 %s328_s1, 4  ;;  %s188_s25 = int_to_ptr.vmem [resolvable:$true] %s187_s25 }
  0x12   :  { %43 = vperm.xlu1 %277, %v29_v2   ;;  %34 = vperm.xlu0 %276, %v26_v3   ;;  %v65_v12 = vld [vmem:[#allocation2 + $0x10] sm:$0xff]  ;;  %v64_v13 = vld [vmem:[#allocation2 + $0x8] sm:$0xff]  ;;  %v63_v14 = vld [vmem:[#allocation2] sm:$0xff]  ;;  %s298_s26 = scalar_lea.vmem %s188_s25, 640  ;;  %p303_p6 = scmp.lt.s32.totalorder %s188_s25, %s188_s25 }
  0x13   :  { %223 = vmatpush3.msra.mxu0 %v70_v4  ;;  %261 = vmatpush3.msra.mxu1 %v70_v4  ;;  %p299_p5 = scmp.ne.s32.totalorder %s188_s25, %s298_s26  ;;  %p304_p7 = scmp.lt.s32.totalorder %s298_s26, %s298_s26 }
  0x14   :  { %224 = vmatprep.subr.mxu0 %v326_v1  ;;  %254 = vmatprep.subr.mxu1 %v326_v1 }
  0x15   :  { %225 = vmatpush3.msra.mxu0 %v69_v7  ;;  %262 = vmatpush3.msra.mxu1 %v69_v7  ;;  %p305_p8 = por %p304_p7, %p303_p6 }
  0x16   :  { %40 = vperm.xlu1 %277, %v28_v5   ;;  %37 = vperm.xlu0 %276, %v27_v6  }
  0x17   :  { %226 = vmatprep.subr.mxu0 %v326_v1  ;;  %255 = vmatprep.subr.mxu1 %v326_v1  ;;  %p306_p9 = pnand %p305_p8, %p299_p5 }
  0x18   :  { %227 = vmatpush3.msra.mxu0 %v68_v8  ;;  %263 = vmatpush3.msra.mxu1 %v68_v8 }
  0x19   :  { %228 = vmatprep.subr.mxu0 %v326_v1  ;;  %256 = vmatprep.subr.mxu1 %v326_v1 }
  0x1a   :  { %46 = vperm.xlu0 %276, %v30_v9   ;;  %229 = vmatpush3.msra.mxu0 %v67_v10 }
  0x1b   :  { %230 = vmatprep.subr.mxu0 %v326_v1  ;;  %264 = vmatpush3.msra.mxu1 %v67_v10 }
  0x1c   :  { %231 = vmatpush3.msra.mxu0 %v66_v11  ;;  %257 = vmatprep.subr.mxu1 %v326_v1 }
  0x1d   :  { %232 = vmatprep.subr.mxu0 %v326_v1  ;;  %265 = vmatpush3.msra.mxu1 %v66_v11 }
  0x1e   :  { %233 = vmatpush3.msra.mxu0 %v65_v12  ;;  %258 = vmatprep.subr.mxu1 %v326_v1 }
  0x1f   :  { %234 = vmatprep.subr.mxu0 %v326_v1  ;;  %266 = vmatpush3.msra.mxu1 %v65_v12 }
  0x20   :  { %235 = vmatpush3.msra.mxu0 %v64_v13  ;;  %259 = vmatprep.subr.mxu1 %v326_v1 }
  0x21   :  { %236 = vmatprep.subr.mxu0 %v326_v1  ;;  %267 = vmatpush3.msra.mxu1 %v64_v13 }
  0x22   :  { %237 = vmatpush3.msra.mxu0 %v63_v14  ;;  %260 = vmatprep.subr.mxu1 %v326_v1 }
  0x23   :  { %268 = vmatpush3.msra.mxu1 %v63_v14 }
  0x8d   :  { %v44_v17 = vpop.permute.xlu1 %43  ;;  %v35_v18 = vpop.permute.xlu0 %34 }
  0x8e   :  { %vm51_vm2 = vcmp.eq.s32.totalorder %v32_v16, %v44_v17  ;;  %vm48_vm3 = vcmp.eq.s32.totalorder %v32_v16, %v35_v18 }
  0x8f   :  { %v202_v19 = vsel %vm51_vm2, 1.0, %v326_v1  ;;  %v199_v20 = vsel %vm48_vm3, 1.0, %v326_v1 }
  0x90   :  { %239 = vmatmul.mubr.msk.f32.vlgmr.msra.gmra.mxu0 %vm71_vm1, %v199_v20  ;;  %248 = vmatmul.mubr.msk.f32.vlgmr.msra.gmra.mxu1 %vm71_vm1, %v202_v19 }
  0x91   :  { %v41_v21 = vpop.permute.xlu1 %40  ;;  %v38_v22 = vpop.permute.xlu0 %37  ;;  %241 = vmatprep.mubr.msk.f32.mxu0 %vm327_vm0, %v326_v1  ;;  %250 = vmatprep.mubr.msk.f32.mxu1 %vm327_vm0, %v326_v1 }
  0x92   :  { %vm49_vm4 = vcmp.eq.s32.totalorder %v32_v16, %v38_v22  ;;  %vm50_vm5 = vcmp.eq.s32.totalorder %v32_v16, %v41_v21 }
  0x93   :  { %v200_v23 = vsel %vm49_vm4, 1.0, %v326_v1  ;;  %v201_v25 = vsel %vm50_vm5, 1.0, %v326_v1 }
  0x94   :  { %242 = vmatmul.mubr.msk.f32.gmra.mxu0 %vm71_vm1, %v200_v23 }
  0x95   :  { %v47_v24 = vpop.permute.xlu0 %46  ;;  %244 = vmatprep.mubr.msk.f32.mxu0 %vm327_vm0, %v326_v1 }
  0x96   :  { %vm52_vm6 = vcmp.eq.s32.totalorder %v32_v16, %v47_v24 }
  0x97   :  { %v203_v26 = vsel %vm52_vm6, 1.0, %v326_v1 }
  0x98   :  { %245 = vmatmul.mubr.msk.f32.gmra.mxu0 %vm71_vm1, %v201_v25  ;;  %251 = vmatmul.mubr.msk.f32.gmra.mxu1 %vm71_vm1, %v203_v26 }
 0x150   :  { %v153_v27 = vpop.f32.mrf.mxu0  ;;  %v168_v28 = vpop.f32.mrf.mxu1 }
 0x151   :  { %177 = vst [vmem:[#allocation5] sm:$0xff] %v153_v27  ;;  %180 = vst [vmem:[#allocation5 + $0x18] sm:$0xff] %v168_v28 }
 0x152   :  { %v240_v29 = vpop.f32.mrf.mxu0  ;;  %v249_v30 = vpop.f32.mrf.mxu1 }
 0x154   :  { %v158_v31 = vpop.f32.mrf.mxu0 }
 0x155   :  { %178 = vst [vmem:[#allocation5 + $0x8] sm:$0xff] %v158_v31 }
 0x156   :  { %v243_v32 = vpop.f32.mrf.mxu0 }
 0x158   :  { %v163_v33 = vpop.f32.mrf.mxu0  ;;  %v173_v34 = vpop.f32.mrf.mxu1 }
 0x159   :  { %179 = vst [vmem:[#allocation5 + $0x10] sm:$0xff] %v163_v33  ;;  %181 = vst [vmem:[#allocation5 + $0x20] sm:$0xff] %v173_v34 }
 0x15a   :  { %v246_v35 = vpop.f32.mrf.mxu0  ;;  %v252_v36 = vpop.f32.mrf.mxu1 }
 0x15b   :  { %309 = shalt.err (!%p306_p9)
}
 0x15c   :  { %193 = dma.vmem_to_hbm [thread:$0]  %s188_s25, 640, %s409_s2, [#allocation4], %s323_s12, %s323_s12, %s324_s13  }
 0x15d   :  { %320 = dma.done.wait [#allocation4], 640  }
 0x15e   :  { %321 = vsyncadd [#allocation4], 4294966656 }
 0x15f   :  { %197 = vsyncpa [#allocation3], 1 }
 0x160   :  { %198 = vsyncpa [#allocation4], 1 }

</bundles_post_ra>
